<compile_context>
chip_gen: v7x
topology: tpu7x:2x2x1
jax: 0.10.0
libtpu: 0.0.40
codegen_flags: <defaults>
</compile_context>

<pallas_src>
import functools

import jax
import jax.numpy as jnp
from jax.experimental import pallas as pl
from jax.experimental.pallas import tpu as pltpu


def stacker_kernel(wm_ref, bm_ref, wd_ref, bd_ref,
                   logits_ref, str_sim_ref,
                   men_ref, desc_ref):
    # Scalar params live in SMEM; tensor tiles are VMEM blocks:
    #   logits_ref: (2, tb, tn), str_sim/men/desc: (tb, tn).
    s = str_sim_ref[...]

    wm0 = wm_ref[0, 0]
    wm1 = wm_ref[0, 1]
    bm = bm_ref[0]
    wd0 = wd_ref[0, 0]
    wd1 = wd_ref[0, 1]
    bd = bd_ref[0]

    men_ref[...] = logits_ref[0] * wm0 + s * wm1 + bm
    desc_ref[...] = logits_ref[1] * wd0 + s * wd1 + bd


def _round_up(x, m):
    return ((x + m - 1) // m) * m


@functools.partial(jax.jit, static_argnames=("max_tb", "max_tn"))
def stacker_forward(logits, str_sim, wm, bm, wd, bd, *, max_tb=256, max_tn=1024):
    """logits: [2, B, N], str_sim: [B, N]. Returns (men [B, N], desc [B, N])."""
    _, B, N = logits.shape
    dtype = logits.dtype

    # Tile sizes: lane-dense (multiple of 128 on N), sublane-aligned (multiple
    # of 8 on B), capped so 5 tensors * 2 (double buffer) * tb*tn*4B ~= 10.5 MiB.
    tb = min(max_tb, _round_up(B, 8))
    tn = min(max_tn, _round_up(N, 128))

    # Non-dividing shapes are handled by Pallas boundary masking (partial edge
    # DMAs); no explicit padding pass over the inputs is needed.
    grid = (pl.cdiv(B, tb), pl.cdiv(N, tn))

    logits_spec = pl.BlockSpec((2, tb, tn), lambda i, j: (0, i, j))
    tile_spec = pl.BlockSpec((tb, tn), lambda i, j: (i, j))
    smem_spec = pl.BlockSpec(memory_space=pltpu.MemorySpace.SMEM)

    men, desc = pl.pallas_call(
        stacker_kernel,
        out_shape=(
            jax.ShapeDtypeStruct((B, N), dtype),
            jax.ShapeDtypeStruct((B, N), dtype),
        ),
        grid=grid,
        in_specs=[
            smem_spec,    # wm  (1, 2)
            smem_spec,    # bm  (1,)
            smem_spec,    # wd  (1, 2)
            smem_spec,    # bd  (1,)
            logits_spec,  # logits (2, B, N)
            tile_spec,    # str_sim (B, N)
        ],
        out_specs=(tile_spec, tile_spec),
        compiler_params=pltpu.CompilerParams(
            dimension_semantics=("parallel", "parallel"),
            vmem_limit_bytes=32 * 1024 * 1024,
        ),
    )(wm, bm, wd, bd, logits, str_sim)

    return men, desc


def reference_forward(logits, str_sim, wm, bm, wd, bd):
    """Pure-JAX reference mirroring the PyTorch module exactly."""
    num_features = 2
    men_in = jnp.stack([logits[0], str_sim], axis=2).reshape(-1, num_features)
    desc_in = jnp.stack([logits[1], str_sim], axis=2).reshape(-1, num_features)
    men = (men_in @ wm.T + bm).reshape(logits[0].shape)
    desc = (desc_in @ wd.T + bd).reshape(logits[1].shape)
    return men, desc


if __name__ == "__main__":
    key = jax.random.PRNGKey(0)
    k1, k2, k3, k4, k5, k6, k7, k8 = jax.random.split(key, 8)

    # Deterministic parameter init (nn.Linear(2, 1) shapes: weight (1, 2), bias (1,)).
    bound = 1.0 / jnp.sqrt(2.0)
    wm = jax.random.uniform(k3, (1, 2), jnp.float32, -bound, bound)
    bm = jax.random.uniform(k4, (1,), jnp.float32, -bound, bound)
    wd = jax.random.uniform(k5, (1, 2), jnp.float32, -bound, bound)
    bd = jax.random.uniform(k6, (1,), jnp.float32, -bound, bound)

    # Case 1: aligned small shape (B=8, N=128) -> single tile.
    B, N = 8, 128
    logits = jax.random.normal(k1, (2, B, N), dtype=jnp.float32)
    str_sim = jax.random.normal(k2, (B, N), dtype=jnp.float32)

    men, desc = stacker_forward(logits, str_sim, wm, bm, wd, bd)
    jax.block_until_ready((men, desc))
    men_ref, desc_ref = reference_forward(logits, str_sim, wm, bm, wd, bd)
    assert men.shape == (B, N) and desc.shape == (B, N)
    assert jnp.allclose(men, men_ref, atol=1e-5, rtol=1e-5)
    assert jnp.allclose(desc, desc_ref, atol=1e-5, rtol=1e-5)

    # Case 2: unaligned shape (exercises Pallas boundary-block masking).
    B2, N2 = 5, 200
    logits2 = jax.random.normal(k7, (2, B2, N2), dtype=jnp.float32)
    str_sim2 = jax.random.normal(k8, (B2, N2), dtype=jnp.float32)

    men2, desc2 = stacker_forward(logits2, str_sim2, wm, bm, wd, bd)
    jax.block_until_ready((men2, desc2))
    men2_ref, desc2_ref = reference_forward(logits2, str_sim2, wm, bm, wd, bd)
    assert men2.shape == (B2, N2) and desc2.shape == (B2, N2)
    assert jnp.allclose(men2, men2_ref, atol=1e-5, rtol=1e-5)
    assert jnp.allclose(desc2, desc2_ref, atol=1e-5, rtol=1e-5)

    print("KERNEL_OK")
</pallas_src>

<mosaic_0001>
module attributes {stable_mosaic.version = 11 : i64} {
  func.func @stacker_kernel(%arg0: i32, %arg1: i32, %arg2: memref<1x2xf32, #tpu.memory_space<smem>>, %arg3: memref<1xf32, #tpu.memory_space<smem>>, %arg4: memref<1x2xf32, #tpu.memory_space<smem>>, %arg5: memref<1xf32, #tpu.memory_space<smem>>, %arg6: memref<2x8x128xf32, #tpu.memory_space<vmem>>, %arg7: memref<8x128xf32, #tpu.memory_space<vmem>>, %arg8: memref<8x128xf32, #tpu.memory_space<vmem>>, %arg9: memref<8x128xf32, #tpu.memory_space<vmem>>) attributes {dimension_semantics = [#tpu.dimension_semantics<parallel>, #tpu.dimension_semantics<parallel>], iteration_bounds = array<i64: 1, 1>, scalar_prefetch = 0 : i64, scratch_operands = 0 : i64, tpu.core_type = #tpu.core_type<tc>, window_params = [{transform_indices = @transform_0, window_bounds = array<i64: 1, 2>}, {transform_indices = @transform_1, window_bounds = array<i64: 1>}, {transform_indices = @transform_2, window_bounds = array<i64: 1, 2>}, {transform_indices = @transform_3, window_bounds = array<i64: 1>}, {transform_indices = @transform_4, window_bounds = array<i64: 2, 8, 128>}, {transform_indices = @transform_5, window_bounds = array<i64: 8, 128>}, {transform_indices = @transform_6, window_bounds = array<i64: 8, 128>}, {transform_indices = @transform_7, window_bounds = array<i64: 8, 128>}]} {
    %c0 = arith.constant 0 : index
    %c0_0 = arith.constant 0 : index
    %0 = vector.load %arg7[%c0, %c0_0] : memref<8x128xf32, #tpu.memory_space<vmem>>, vector<8x128xf32>
    %c0_1 = arith.constant 0 : index
    %c0_2 = arith.constant 0 : index
    %1 = memref.load %arg2[%c0_1, %c0_2] : memref<1x2xf32, #tpu.memory_space<smem>>
    %c0_3 = arith.constant 0 : index
    %c1 = arith.constant 1 : index
    %2 = memref.load %arg2[%c0_3, %c1] : memref<1x2xf32, #tpu.memory_space<smem>>
    %c0_4 = arith.constant 0 : index
    %3 = memref.load %arg3[%c0_4] : memref<1xf32, #tpu.memory_space<smem>>
    %c0_5 = arith.constant 0 : index
    %c0_6 = arith.constant 0 : index
    %4 = memref.load %arg4[%c0_5, %c0_6] : memref<1x2xf32, #tpu.memory_space<smem>>
    %c0_7 = arith.constant 0 : index
    %c1_8 = arith.constant 1 : index
    %5 = memref.load %arg4[%c0_7, %c1_8] : memref<1x2xf32, #tpu.memory_space<smem>>
    %c0_9 = arith.constant 0 : index
    %6 = memref.load %arg5[%c0_9] : memref<1xf32, #tpu.memory_space<smem>>
    %c0_10 = arith.constant 0 : index
    %c0_11 = arith.constant 0 : index
    %c0_12 = arith.constant 0 : index
    %7 = vector.load %arg6[%c0_10, %c0_11, %c0_12] : memref<2x8x128xf32, #tpu.memory_space<vmem>>, vector<1x8x128xf32>
    %8 = vector.shape_cast %7 : vector<1x8x128xf32> to vector<8x128xf32>
    %9 = vector.broadcast %1 : f32 to vector<8x128xf32>
    %10 = arith.mulf %8, %9 : vector<8x128xf32>
    %11 = vector.broadcast %2 : f32 to vector<8x128xf32>
    %12 = arith.mulf %0, %11 : vector<8x128xf32>
    %13 = arith.addf %10, %12 : vector<8x128xf32>
    %14 = vector.broadcast %3 : f32 to vector<8x128xf32>
    %15 = arith.addf %13, %14 : vector<8x128xf32>
    %c0_13 = arith.constant 0 : index
    %c0_14 = arith.constant 0 : index
    %16 = vector.load %arg8[%c0_13, %c0_14] : memref<8x128xf32, #tpu.memory_space<vmem>>, vector<8x128xf32>
    tpu.vector_store %arg8[%c0_13, %c0_14], %15 {strides = array<i32>} : memref<8x128xf32, #tpu.memory_space<vmem>>, vector<8x128xf32>,
    %c1_15 = arith.constant 1 : index
    %c0_16 = arith.constant 0 : index
    %c0_17 = arith.constant 0 : index
    %17 = vector.load %arg6[%c1_15, %c0_16, %c0_17] : memref<2x8x128xf32, #tpu.memory_space<vmem>>, vector<1x8x128xf32>
    %18 = vector.shape_cast %17 : vector<1x8x128xf32> to vector<8x128xf32>
    %19 = vector.broadcast %4 : f32 to vector<8x128xf32>
    %20 = arith.mulf %18, %19 : vector<8x128xf32>
    %21 = vector.broadcast %5 : f32 to vector<8x128xf32>
    %22 = arith.mulf %0, %21 : vector<8x128xf32>
    %23 = arith.addf %20, %22 : vector<8x128xf32>
    %24 = vector.broadcast %6 : f32 to vector<8x128xf32>
    %25 = arith.addf %23, %24 : vector<8x128xf32>
    %c0_18 = arith.constant 0 : index
    %c0_19 = arith.constant 0 : index
    %26 = vector.load %arg9[%c0_18, %c0_19] : memref<8x128xf32, #tpu.memory_space<vmem>>, vector<8x128xf32>
    tpu.vector_store %arg9[%c0_18, %c0_19], %25 {strides = array<i32>} : memref<8x128xf32, #tpu.memory_space<vmem>>, vector<8x128xf32>,
    return
  }
  func.func @transform_0(%arg0: i32, %arg1: i32) -> (i32, i32) {
    %c0_i32 = arith.constant 0 : i32
    %c0_i32_0 = arith.constant 0 : i32
    %c0_i32_1 = arith.constant 0 : i32
    return %c0_i32, %c0_i32_0 : i32, i32
  }
  func.func @transform_1(%arg0: i32, %arg1: i32) -> i32 {
    %c0_i32 = arith.constant 0 : i32
    %c0_i32_0 = arith.constant 0 : i32
    return %c0_i32 : i32
  }
  func.func @transform_2(%arg0: i32, %arg1: i32) -> (i32, i32) {
    %c0_i32 = arith.constant 0 : i32
    %c0_i32_0 = arith.constant 0 : i32
    %c0_i32_1 = arith.constant 0 : i32
    return %c0_i32, %c0_i32_0 : i32, i32
  }
  func.func @transform_3(%arg0: i32, %arg1: i32) -> i32 {
    %c0_i32 = arith.constant 0 : i32
    %c0_i32_0 = arith.constant 0 : i32
    return %c0_i32 : i32
  }
  func.func @transform_4(%arg0: i32, %arg1: i32) -> (i32, i32, i32) {
    %c0_i32 = arith.constant 0 : i32
    %c0_i32_0 = arith.constant 0 : i32
    return %c0_i32, %arg0, %arg1 : i32, i32, i32
  }
  func.func @transform_5(%arg0: i32, %arg1: i32) -> (i32, i32) {
    %c0_i32 = arith.constant 0 : i32
    return %arg0, %arg1 : i32, i32
  }
  func.func @transform_6(%arg0: i32, %arg1: i32) -> (i32, i32) {
    %c0_i32 = arith.constant 0 : i32
    return %arg0, %arg1 : i32, i32
  }
  func.func @transform_7(%arg0: i32, %arg1: i32) -> (i32, i32) {
    %c0_i32 = arith.constant 0 : i32
    return %arg0, %arg1 : i32, i32
  }
}

</mosaic_0001>

<bundles_post_ra>
// kernel: stacker_forward.1
= control target key start
LH: loop header
LB: loop body
LE: loop exit
PB: predicated region body
PF: predicated region fallthrough
CT: control target
= control target key end

     0   :  { %15 = vsyncpa [#allocation7], 0  ;;  %s332_s0 = inlined_call_operand.vmem [shape: f32[1,2], index: 0, kind: input, shape index: {}]   ;;  %s333_s1 = inlined_call_operand.<no memory space> [shape: f32[1], index: 1, kind: input, shape index: {}]   ;;  %s334_s2 = inlined_call_operand.vmem [shape: f32[1,2], index: 2, kind: input, shape index: {}]   ;;  %s335_s3 = inlined_call_operand.<no memory space> [shape: f32[1], index: 3, kind: input, shape index: {}]   ;;  %s336_s4 = inlined_call_operand.hbm [shape: f32[2,8,128], index: 4, kind: input, shape index: {}]   ;;  %s337_s5 = inlined_call_operand.vmem [shape: f32[8,128], index: 5, kind: input, shape index: {}]   ;;  %s338_s6 = inlined_call_operand.hbm [shape: f32[8,128], index: 6, kind: output, shape index: {0}]   ;;  %s339_s7 = inlined_call_operand.hbm [shape: f32[8,128], index: 7, kind: output, shape index: {1}]  }
   0x1   :  { %16 = vsyncpa [#allocation9], 0 }
   0x2   :  { %17 = vsyncpa [#allocation5], 0 }
   0x3   :  { %18 = vsyncpa [#allocation6], 0 }
   0x4   :  { %19 = vsyncpa [#allocation13], 0  ;;  %s26_s26 = sshll.u32 %s332_s0, 4  ;;  %s38_s29 = sshll.u32 %s334_s2, 4  ;;  %s27_s26 = int_to_ptr.vmem [resolvable:$true] %s26_s26  ;;  %s39_s29 = int_to_ptr.vmem [resolvable:$true] %s38_s29 }
   0x5   :  { %s134_s30 = scalar_lea.vmem %s27_s26, 16  ;;  %p139_p1 = scmp.lt.s32.totalorder %s27_s26, %s27_s26 }
   0x6   :  { %p135_p0 = scmp.ne.s32.totalorder %s27_s26, %s134_s30  ;;  %p140_p2 = scmp.lt.s32.totalorder %s134_s30, %s134_s30 }
   0x8   :  { %p141_p3 = por %p140_p2, %p139_p1 }
   0xa   :  { %p142_p4 = pnand %p141_p3, %p135_p0 }
   0xc   :  { %145 = shalt.err (!%p142_p4)
}
   0xd   :  { %s234_s8 = smov [#allocation4]   ;;  %s146_s9 = scalar_lea.vmem %s39_s29, 16 }
   0xe   :  { %29 = dma.vmem_to_smem %s27_s26, 16, %s234_s8, [#allocation7]  }
   0xf   :  { %p147_p5 = scmp.ne.s32.totalorder %s39_s29, %s146_s9  ;;  %p151_p6 = scmp.lt.s32.totalorder %s39_s29, %s39_s29 }
  0x10   :  { %p152_p7 = scmp.lt.s32.totalorder %s146_s9, %s146_s9 }
  0x12   :  { %p153_p8 = por %p152_p7, %p151_p6 }
  0x14   :  { %p154_p9 = pnand %p153_p8, %p147_p5 }
  0x16   :  { %157 = shalt.err (!%p154_p9)
}
  0x17   :  { %s235_s0 = smov [#allocation8]   ;;  %s236_s2 = smov [#allocation10]  }
  0x18   :  { %41 = dma.vmem_to_smem %s39_s29, 16, %s235_s0, [#allocation9]  }
  0x19   :  { %s49_s10 = sshll.u32 %s236_s2, 4  ;;  %s158_s13 = scalar_lea.hbm %s336_s4, 256  ;;  %s50_s10 = int_to_ptr.vmem [resolvable:$true] %s49_s10 }
  0x1a   :  { %p159_p10 = scmp.ne.s32.totalorder %s336_s4, %s158_s13  ;;  %p162_p11 = scmp.lt.u32.totalorder %s158_s13, %s336_s4 }
  0x1c   :  { %p164_p12 = pnand %p162_p11, %p159_p10 }
  0x1e   :  { %167 = shalt.err (!%p164_p12)
}
  0x1f   :  { %s168_s18 = scalar_lea.vmem %s50_s10, 256  ;;  %p173_p0 = scmp.lt.s32.totalorder %s50_s10, %s50_s10 }
  0x20   :  { %p169_p13 = scmp.ne.s32.totalorder %s50_s10, %s168_s18  ;;  %p174_p1 = scmp.lt.s32.totalorder %s168_s18, %s168_s18 }
  0x22   :  { %p175_p2 = por %p174_p1, %p173_p0 }
  0x24   :  { %p176_p3 = pnand %p175_p2, %p169_p13 }
  0x26   :  { %179 = shalt.err (!%p176_p3)
}
  0x27   :  { %s237_s19 = smov 128   ;;  %s238_s20 = smov 8  }
  0x28   :  { %55 = dma.hbm_to_vmem [thread:$0]  %s336_s4, 256, %s50_s10, [#allocation5], %s237_s19, %s237_s19, %s238_s20  }
  0x29   :  { %224 = dma.done.wait [#allocation7], 16  }
  0x2a   :  { %225 = vsyncadd [#allocation7], 4294967280 }
  0x2b   :  { %226 = dma.done.wait [#allocation9], 16  }
  0x2c   :  { %227 = vsyncadd [#allocation9], 4294967280 }
  0x2d   :  { %228 = dma.done.wait [#allocation5], 256  }
  0x2e   :  { %229 = vsyncadd [#allocation5], 4294967040 }
  0x2f   :  { %67 = sfence }
  0x30   :  { %s69_s23 = sld [smem:[#allocation4]]  ;;  %s125_s24 = sld [smem:[#allocation4 + $0x1]]  ;;  %v68_v0 = vld [vmem:[%s337_s5] sm:$0xff]  ;;  %v85_v2 = vld [vmem:[#allocation10 + $0x8] sm:$0xff]  ;;  %v81_v9 = vstv %s333_s1  ;;  %v91_v13 = vstv %s335_s3 }
  0x31   :  { %s72_s25 = sld [smem:[#allocation8]]  ;;  %s126_s26 = sld [smem:[#allocation8 + $0x1]]  ;;  %v75_v1 = vld [vmem:[#allocation10] sm:$0xff] }
  0x32   :  { %s239_s30 = smov [#allocation11]   ;;  %s240_s5 = smov [#allocation12]  }
  0x33   :  { %s100_s8 = sshll.u32 %s239_s30, 4  ;;  %s110_s2 = sshll.u32 %s240_s5, 4  ;;  %s101_s8 = int_to_ptr.vmem [resolvable:$true] %s100_s8  ;;  %s111_s2 = int_to_ptr.vmem [resolvable:$true] %s110_s2 }
  0x34   :  { %s180_s10 = scalar_lea.vmem %s101_s8, 128  ;;  %p185_p5 = scmp.lt.s32.totalorder %s101_s8, %s101_s8 }
  0x35   :  { %p181_p4 = scmp.ne.s32.totalorder %s101_s8, %s180_s10  ;;  %p186_p6 = scmp.lt.s32.totalorder %s180_s10, %s180_s10 }
  0x36   :  { %v76_v3 = vstv %s69_s23  ;;  %v78_v4 = vstv %s125_s24 }
  0x37   :  { %v77_v5 = vmul.f32 %v76_v3, %v75_v1  ;;  %v79_v6 = vmul.f32 %v78_v4, %v68_v0  ;;  %v86_v7 = vstv %s72_s25  ;;  %v88_v8 = vstv %s126_s26  ;;  %p187_p7 = por %p186_p6, %p185_p5 }
  0x38   :  { %v87_v10 = vmul.f32 %v86_v7, %v85_v2  ;;  %v89_v11 = vmul.f32 %v88_v8, %v68_v0 }
  0x39   :  { %v80_v12 = vadd.f32 %v79_v6, %v77_v5  ;;  %p188_p8 = pnand %p187_p7, %p181_p4 }
  0x3a   :  { %v90_v14 = vadd.f32 %v89_v11, %v87_v10 }
  0x3b   :  { %v82_v15 = vadd.f32 %v81_v9, %v80_v12 }
  0x3c   :  { %v92_v16 = vadd.f32 %v91_v13, %v90_v14 }
  0x3d   :  { %83 = vst [vmem:[#allocation11] sm:$0xff] %v82_v15 }
  0x3e   :  { %93 = vst [vmem:[#allocation12] sm:$0xff] %v92_v16 }
  0x3f   :  { %191 = shalt.err (!%p188_p8)
}
  0x40   :  { %s192_s3 = scalar_lea.hbm %s338_s6, 128 }
  0x41   :  { %p193_p9 = scmp.ne.s32.totalorder %s338_s6, %s192_s3  ;;  %p196_p10 = scmp.lt.u32.totalorder %s192_s3, %s338_s6 }
  0x43   :  { %p198_p11 = pnand %p196_p10, %p193_p9 }
  0x45   :  { %201 = shalt.err (!%p198_p11)
}
  0x46   :  { %103 = dma.vmem_to_hbm [thread:$0]  %s101_s8, 128, %s338_s6, [#allocation6]  }
  0x47   :  { %s202_s18 = scalar_lea.vmem %s111_s2, 128  ;;  %p207_p13 = scmp.lt.s32.totalorder %s111_s2, %s111_s2 }
  0x48   :  { %p203_p12 = scmp.ne.s32.totalorder %s111_s2, %s202_s18  ;;  %p208_p0 = scmp.lt.s32.totalorder %s202_s18, %s202_s18 }
  0x4a   :  { %p209_p1 = por %p208_p0, %p207_p13 }
  0x4c   :  { %p210_p2 = pnand %p209_p1, %p203_p12 }
  0x4e   :  { %213 = shalt.err (!%p210_p2)
}
  0x4f   :  { %s214_s21 = scalar_lea.hbm %s339_s7, 128 }
  0x50   :  { %p215_p3 = scmp.ne.s32.totalorder %s339_s7, %s214_s21  ;;  %p218_p4 = scmp.lt.u32.totalorder %s214_s21, %s339_s7 }
  0x52   :  { %p220_p5 = pnand %p218_p4, %p215_p3 }
  0x54   :  { %223 = shalt.err (!%p220_p5)
}
  0x55   :  { %113 = dma.vmem_to_hbm [thread:$0]  %s111_s2, 128, %s339_s7, [#allocation13]  }
  0x56   :  { %230 = dma.done.wait [#allocation6], 128  }
  0x57   :  { %231 = vsyncadd [#allocation6], 4294967168 }
  0x58   :  { %232 = dma.done.wait [#allocation13], 128  }
  0x59   :  { %233 = vsyncadd [#allocation13], 4294967168 }
  0x5a   :  { %120 = vsyncpa [#allocation5], 1 }
  0x5b   :  { %121 = vsyncpa [#allocation6], 1 }
  0x5c   :  { %122 = vsyncpa [#allocation13], 1 }
  0x5d   :  { %123 = vsyncpa [#allocation7], 1 }
  0x5e   :  { %124 = vsyncpa [#allocation9], 1 }

</bundles_post_ra>
